<compile_context>
chip_gen: v6e
topology: v6e:2x2x1
jax: 0.10.0
libtpu: 0.0.40
codegen_flags: <defaults>
</compile_context>

<pallas_src>
import math

import jax
import jax.numpy as jnp
import numpy as np
from jax.experimental import pallas as pl
from jax.experimental.pallas import tpu as pltpu  # noqa: F401  (TPU backend)

# ----------------------------- problem sizes -----------------------------
B = 2           # batch
N = 16          # sequence length (tokens)
C = 32          # hidden_size
OC = 16         # out_channels
EPS = 1e-6      # LayerNorm eps


# ------------------------------- kernel ----------------------------------
def final_layer_kernel(x_ref, c_ref, w_ada_ref, b_ada_ref, w_lin_ref,
                       b_lin_ref, o_ref):
    # All refs are whole arrays resident in VMEM; single grid-less invocation.
    x = x_ref[...].astype(jnp.float32)          # (B*N, C) token rows
    c = c_ref[...].astype(jnp.float32)          # (B, C)   per-batch conditioning

    bn = x_ref.shape[0]                         # B*N (static)
    b = c_ref.shape[0]                          # B   (static)
    n_per = bn // b                             # tokens per batch row

    # In-kernel broadcast of the conditioning to token rows:
    # one-hot selector (B*N, B) built on the VPU (no division: range compare),
    # then a tiny MXU push.  Row ordering matches x.reshape(B*N, C) batch-major.
    tok = jax.lax.broadcasted_iota(jnp.int32, (bn, b), 0)
    bat = jax.lax.broadcasted_iota(jnp.int32, (bn, b), 1)
    sel = jnp.logical_and(tok >= bat * n_per,
                          tok < (bat + 1) * n_per).astype(jnp.float32)
    c_tok = jnp.dot(sel, c, preferred_element_type=jnp.float32)   # (B*N, C)

    # adaLN_modulation: Linear(C -> 2C), pre-split into shift / (1+scale)
    # halves at init time; "+1" already folded into the scale bias.
    shift = jnp.dot(c_tok, w_ada_ref[0],
                    preferred_element_type=jnp.float32) + b_ada_ref[0:1, :]
    scale1 = jnp.dot(c_tok, w_ada_ref[1],
                     preferred_element_type=jnp.float32) + b_ada_ref[1:2, :]

    # LayerNorm over channels (no affine, eps=1e-6), like nn.LayerNorm.
    mu = jnp.mean(x, axis=-1, keepdims=True)
    xc = x - mu
    var = jnp.mean(xc * xc, axis=-1, keepdims=True)
    xn = xc * jax.lax.rsqrt(var + EPS)

    # modulate: x * (1 + scale) + shift   ("+1" folded into scale1)
    y = xn * scale1 + shift

    # final Linear (hidden -> out_channels) on the MXU, one (B*N, C) push.
    out = jnp.dot(y, w_lin_ref[...],
                  preferred_element_type=jnp.float32) + b_lin_ref[...]
    o_ref[...] = out.astype(o_ref.dtype)


# --------------------------- one-time param prep ---------------------------
def prepare_final_layer_params(w_ada, b_ada, w_lin, b_lin):
    """One-time (module-init-style) parameter preparation.

    Splits the adaLN weight into shift/scale halves, folds the '+1' of
    modulate's (1 + scale) into the scale bias, and stacks the halves so the
    per-call kernel takes 6 operands instead of 8.
    """
    c = w_ada.shape[0]
    w_ada_stack = jnp.stack([w_ada[:, :c], w_ada[:, c:]], axis=0)      # (2, C, C)
    b_ada_stack = jnp.stack([b_ada[:c], b_ada[c:] + 1.0], axis=0)      # (2, C)
    b_lin2 = b_lin.reshape(1, -1)                                      # (1, OC)
    return w_ada_stack, b_ada_stack, w_lin, b_lin2


# ------------------------------- wrapper ----------------------------------
def final_layer_pallas(x, c, w_ada_stack, b_ada_stack, w_lin, b_lin2):
    """x: (B, N, C); c: (B, C); params from prepare_final_layer_params."""
    bx, nx, cx = x.shape
    ocx = w_lin.shape[1]

    # Contiguous (B, N, C) -> (B*N, C) is a bitcast-level reshape; the only
    # per-call op besides the pallas_call itself.
    x2 = x.reshape(bx * nx, cx)

    out2 = pl.pallas_call(
        final_layer_kernel,
        out_shape=jax.ShapeDtypeStruct((bx * nx, ocx), x.dtype),
    )(x2, c, w_ada_stack, b_ada_stack, w_lin, b_lin2)
    return out2.reshape(bx, nx, ocx)


# --------------------------- pure-JAX reference ----------------------------
def final_layer_ref(x, c, w_ada, b_ada, w_lin, b_lin):
    hidden = c.shape[-1]
    mod = c @ w_ada + b_ada                               # (B, 2C)
    shift, scale = mod[:, :hidden], mod[:, hidden:]
    mu = jnp.mean(x, axis=-1, keepdims=True)
    var = jnp.mean((x - mu) ** 2, axis=-1, keepdims=True)
    xn = (x - mu) / jnp.sqrt(var + EPS)
    y = xn * (1.0 + scale[:, None, :]) + shift[:, None, :]
    return y @ w_lin + b_lin[None, None, :]


# --------------------------------- main ------------------------------------
if __name__ == "__main__":
    key = jax.random.PRNGKey(0)
    kx, kc, kw1, kb1, kw2, kb2 = jax.random.split(key, 6)

    x = jax.random.normal(kx, (B, N, C), dtype=jnp.float32)
    c = jax.random.normal(kc, (B, C), dtype=jnp.float32)

    # deterministic synthetic parameters matching the module's shapes
    w_ada = jax.random.normal(kw1, (C, 2 * C), dtype=jnp.float32) * (1.0 / math.sqrt(C))
    b_ada = jax.random.normal(kb1, (2 * C,), dtype=jnp.float32) * 0.01
    w_lin = jax.random.normal(kw2, (C, OC), dtype=jnp.float32) * (1.0 / math.sqrt(C))
    b_lin = jax.random.normal(kb2, (OC,), dtype=jnp.float32) * 0.01

    # One-time init (analogous to nn.Module.__init__) — not a per-call cost.
    params = prepare_final_layer_params(w_ada, b_ada, w_lin, b_lin)

    out = final_layer_pallas(x, c, *params)
    out = jax.block_until_ready(out)

    ref = final_layer_ref(x, c, w_ada, b_ada, w_lin, b_lin)
    np.testing.assert_allclose(np.asarray(out), np.asarray(ref),
                               rtol=1e-5, atol=1e-5)
    print("KERNEL_OK")
</pallas_src>

<mosaic_0001>
module attributes {stable_mosaic.version = 11 : i64} {
  func.func @final_layer_kernel(%arg0: memref<32x32xf32, #tpu.memory_space<vmem>>, %arg1: memref<2x32xf32, #tpu.memory_space<vmem>>, %arg2: memref<2x32x32xf32, #tpu.memory_space<vmem>>, %arg3: memref<2x32xf32, #tpu.memory_space<vmem>>, %arg4: memref<32x16xf32, #tpu.memory_space<vmem>>, %arg5: memref<1x16xf32, #tpu.memory_space<vmem>>, %arg6: memref<32x16xf32, #tpu.memory_space<vmem>>) attributes {dimension_semantics = [], scalar_prefetch = 0 : i64, scratch_operands = 0 : i64, tpu.core_type = #tpu.core_type<tc>} {
    %c0 = arith.constant 0 : index
    %c0_0 = arith.constant 0 : index
    %0 = vector.load %arg0[%c0, %c0_0] : memref<32x32xf32, #tpu.memory_space<vmem>>, vector<32x32xf32>
    %c0_1 = arith.constant 0 : index
    %c0_2 = arith.constant 0 : index
    %1 = vector.load %arg1[%c0_1, %c0_2] : memref<2x32xf32, #tpu.memory_space<vmem>>, vector<2x32xf32>
    %2 = tpu.iota {dimensions = array<i32: 0>} : vector<32x2xi32>
    %3 = tpu.iota {dimensions = array<i32: 1>} : vector<32x2xi32>
    %c16_i32 = arith.constant 16 : i32
    %4 = vector.broadcast %c16_i32 : i32 to vector<32x2xi32>
    %5 = arith.muli %3, %4 : vector<32x2xi32>
    %6 = arith.cmpi sge, %2, %5 : vector<32x2xi32>
    %c1_i32 = arith.constant 1 : i32
    %7 = vector.broadcast %c1_i32 : i32 to vector<32x2xi32>
    %8 = arith.addi %3, %7 : vector<32x2xi32>
    %c16_i32_3 = arith.constant 16 : i32
    %9 = vector.broadcast %c16_i32_3 : i32 to vector<32x2xi32>
    %10 = arith.muli %8, %9 : vector<32x2xi32>
    %11 = arith.cmpi slt, %2, %10 : vector<32x2xi32>
    %12 = arith.andi %6, %11 : vector<32x2xi1>
    %13 = arith.extui %12 : vector<32x2xi1> to vector<32x2xi32>
    %14 = arith.sitofp %13 : vector<32x2xi32> to vector<32x2xf32>
    %cst = arith.constant dense<0.000000e+00> : vector<32x32xf32>
    %15 = tpu.matmul %14, %1, %cst {dimension_numbers = #tpu.dot_dimension_numbers<[1], [0], [0], [1], [0, 0, 1, 1], [], []>} : vector<32x2xf32>, vector<2x32xf32>, vector<32x32xf32> -> vector<32x32xf32>
    %c0_4 = arith.constant 0 : index
    %c0_5 = arith.constant 0 : index
    %c0_6 = arith.constant 0 : index
    %16 = vector.load %arg2[%c0_4, %c0_5, %c0_6] : memref<2x32x32xf32, #tpu.memory_space<vmem>>, vector<1x32x32xf32>
    %17 = vector.shape_cast %16 : vector<1x32x32xf32> to vector<32x32xf32>
    %cst_7 = arith.constant dense<0.000000e+00> : vector<32x32xf32>
    %18 = tpu.matmul %15, %17, %cst_7 {dimension_numbers = #tpu.dot_dimension_numbers<[1], [0], [0], [1], [0, 0, 1, 1], [], []>} : vector<32x32xf32>, vector<32x32xf32>, vector<32x32xf32> -> vector<32x32xf32>
    %c0_8 = arith.constant 0 : index
    %c0_9 = arith.constant 0 : index
    %19 = vector.load %arg3[%c0_8, %c0_9] : memref<2x32xf32, #tpu.memory_space<vmem>>, vector<1x32xf32>
    %20 = vector.broadcast %19 : vector<1x32xf32> to vector<32x32xf32>
    %21 = arith.addf %18, %20 : vector<32x32xf32>
    %c1 = arith.constant 1 : index
    %c0_10 = arith.constant 0 : index
    %c0_11 = arith.constant 0 : index
    %22 = vector.load %arg2[%c1, %c0_10, %c0_11] : memref<2x32x32xf32, #tpu.memory_space<vmem>>, vector<1x32x32xf32>
    %23 = vector.shape_cast %22 : vector<1x32x32xf32> to vector<32x32xf32>
    %cst_12 = arith.constant dense<0.000000e+00> : vector<32x32xf32>
    %24 = tpu.matmul %15, %23, %cst_12 {dimension_numbers = #tpu.dot_dimension_numbers<[1], [0], [0], [1], [0, 0, 1, 1], [], []>} : vector<32x32xf32>, vector<32x32xf32>, vector<32x32xf32> -> vector<32x32xf32>
    %c1_13 = arith.constant 1 : index
    %c0_14 = arith.constant 0 : index
    %25 = vector.load %arg3[%c1_13, %c0_14] : memref<2x32xf32, #tpu.memory_space<vmem>>, vector<1x32xf32>
    %26 = vector.broadcast %25 : vector<1x32xf32> to vector<32x32xf32>
    %27 = arith.addf %24, %26 : vector<32x32xf32>
    %cst_15 = arith.constant dense<0.000000e+00> : vector<32xf32>
    %28 = vector.multi_reduction <add>, %0, %cst_15 [1] : vector<32x32xf32> to vector<32xf32>
    %29 = vector.shape_cast %28 : vector<32xf32> to vector<32x1xf32>
    %cst_16 = arith.constant 3.200000e+01 : f32
    %30 = vector.broadcast %cst_16 : f32 to vector<32x1xf32>
    %31 = arith.divf %29, %30 : vector<32x1xf32>
    %32 = vector.broadcast %31 : vector<32x1xf32> to vector<32x32xf32>
    %33 = arith.subf %0, %32 : vector<32x32xf32>
    %34 = arith.mulf %33, %33 : vector<32x32xf32>
    %cst_17 = arith.constant dense<0.000000e+00> : vector<32xf32>
    %35 = vector.multi_reduction <add>, %34, %cst_17 [1] : vector<32x32xf32> to vector<32xf32>
    %36 = vector.shape_cast %35 : vector<32xf32> to vector<32x1xf32>
    %cst_18 = arith.constant 3.200000e+01 : f32
    %37 = vector.broadcast %cst_18 : f32 to vector<32x1xf32>
    %38 = arith.divf %36, %37 : vector<32x1xf32>
    %cst_19 = arith.constant 9.99999997E-7 : f32
    %39 = vector.broadcast %cst_19 : f32 to vector<32x1xf32>
    %40 = arith.addf %38, %39 : vector<32x1xf32>
    %41 = math.rsqrt %40 : vector<32x1xf32>
    %42 = vector.broadcast %41 : vector<32x1xf32> to vector<32x32xf32>
    %43 = arith.mulf %33, %42 : vector<32x32xf32>
    %44 = arith.mulf %43, %27 : vector<32x32xf32>
    %45 = arith.addf %44, %21 : vector<32x32xf32>
    %c0_20 = arith.constant 0 : index
    %c0_21 = arith.constant 0 : index
    %46 = vector.load %arg4[%c0_20, %c0_21] : memref<32x16xf32, #tpu.memory_space<vmem>>, vector<32x16xf32>
    %cst_22 = arith.constant dense<0.000000e+00> : vector<32x16xf32>
    %47 = tpu.matmul %45, %46, %cst_22 {dimension_numbers = #tpu.dot_dimension_numbers<[1], [0], [0], [1], [0, 0, 1, 1], [], []>} : vector<32x32xf32>, vector<32x16xf32>, vector<32x16xf32> -> vector<32x16xf32>
    %c0_23 = arith.constant 0 : index
    %c0_24 = arith.constant 0 : index
    %48 = vector.load %arg5[%c0_23, %c0_24] : memref<1x16xf32, #tpu.memory_space<vmem>>, vector<1x16xf32>
    %49 = vector.broadcast %48 : vector<1x16xf32> to vector<32x16xf32>
    %50 = arith.addf %47, %49 : vector<32x16xf32>
    %c0_25 = arith.constant 0 : index
    %c0_26 = arith.constant 0 : index
    %51 = vector.load %arg6[%c0_25, %c0_26] : memref<32x16xf32, #tpu.memory_space<vmem>>, vector<32x16xf32>
    tpu.vector_store %arg6[%c0_25, %c0_26], %50 {strides = array<i32>} : memref<32x16xf32, #tpu.memory_space<vmem>>, vector<32x16xf32>,
    return
  }
}

</mosaic_0001>

<bundles_post_ra>
// kernel: tpu_custom_call.1
= control target key start
LH: loop header
LB: loop body
LE: loop exit
PB: predicated region body
PF: predicated region fallthrough
CT: control target
= control target key end

     0   :  { %11 = vsyncpa [#allocation3], 0  ;;  %s700_s21 = smov [#allocation2]   ;;  %s843_s0 = inlined_call_operand.vmem [shape: f32[32,32], index: 0, kind: input, shape index: {}]   ;;  %s844_s1 = inlined_call_operand.vmem [shape: f32[2,32], index: 1, kind: input, shape index: {}]   ;;  %s845_s2 = inlined_call_operand.hbm [shape: f32[2,32,32], index: 2, kind: input, shape index: {}]   ;;  %s846_s3 = inlined_call_operand.vmem [shape: f32[2,32], index: 3, kind: input, shape index: {}]   ;;  %s847_s4 = inlined_call_operand.vmem [shape: f32[32,16], index: 4, kind: input, shape index: {}]   ;;  %s848_s5 = inlined_call_operand.vmem [shape: f32[1,16], index: 5, kind: input, shape index: {}]   ;;  %s849_s6 = inlined_call_operand.vmem [shape: f32[32,16], index: 6, kind: output, shape index: {}]  }
   0x1   :  { %s21_s22 = sshll.u32 %s700_s21, 4  ;;  %s22_s22 = int_to_ptr.vmem [resolvable:$true] %s21_s22 }
   0x2   :  { %s686_s23 = scalar_lea.vmem %s22_s22, 1024  ;;  %p691_p1 = scmp.lt.s32.totalorder %s22_s22, %s22_s22 }
   0x3   :  { %p687_p0 = scmp.ne.s32.totalorder %s22_s22, %s686_s23  ;;  %p692_p2 = scmp.lt.s32.totalorder %s686_s23, %s686_s23 }
   0x5   :  { %p693_p3 = por %p692_p2, %p691_p1 }
   0x7   :  { %p694_p4 = pnand %p693_p3, %p687_p0 }
   0x9   :  { %697 = shalt.err (!%p694_p4)
}
   0xa   :  { %s701_s24 = smov 128   ;;  %s702_s25 = smov 8  }
   0xb   :  { %27 = dma.hbm_to_vmem [thread:$0]  %s845_s2, 1024, %s22_s22, [#allocation3], %s701_s24, %s701_s24, %s702_s25  }
   0xc   :  { %698 = dma.done.wait [#allocation3], 1024  }
   0xd   :  { %699 = vsyncadd [#allocation3], 4294966272  ;;  %v42_v0 = vlaneseq  ;;  %vm183_vm0 = vcmask 261120   ;;  %vm85_vm1 = vcmask 1041408   ;;  %v745_v9 = vld [vmem:[%s843_s0] sm:$0xff]  ;;  %vm72_vm3 = vcmask 15360  }
   0xe   :  { %v41_v10 = vld [vmem:[%s844_s1] sm:$0x3]  ;;  %v38_v11 = vld [vmem:[%s843_s0 + $0x8] sm:$0xff]  ;;  %v376_v12 = vsel %vm183_vm0, %v745_v9, 0.0  ;;  %v39_v14 = vld [vmem:[%s843_s0 + $0x10] sm:$0xff]  ;;  %v703_v16 = vmov 0.0  }
   0xf   :  { %v43_v1 = vshrl.u32 %v42_v0, 7  ;;  %v48_v2 = vand.u32 127, %v42_v0  ;;  %608 = vmatprep.subr.msk.mxu0 %vm85_vm1, %v41_v10  ;;  %v379_v13 = vsel %vm183_vm0, %v38_v11, 0.0  ;;  %v40_v15 = vld [vmem:[%s843_s0 + $0x18] sm:$0xff]  ;;  %377 = vadd.xlane.f32.xlu0 %v376_v12  ;;  %v382_v18 = vsel %vm183_vm0, %v39_v14, 0.0  ;;  %v284_v25 = vld [vmem:[#allocation2 + $0x30] sm:$0xff] }
  0x10   :  { %609 = vmatpush3.msk.msra.mxu0 %vm85_vm1, %v41_v10  ;;  %380 = vadd.xlane.f32.xlu1 %v379_v13  ;;  %v385_v20 = vsel %vm183_vm0, %v40_v15, 0.0  ;;  %v285_v23 = vld [vmem:[#allocation2 + $0x38] sm:$0xff]  ;;  %v176_v26 = vld [vmem:[#allocation2 + $0x10] sm:$0xff]  ;;  %v283_v27 = vld [vmem:[#allocation2 + $0x28] sm:$0xff]  ;;  %vm545_vm15 = vcmask 130048  }
  0x11   :  { %v49_v3 = vmul.u32 16, %v48_v2  ;;  %v54_v4 = vadd.s32 1, %v48_v2  ;;  %v44_v5 = vadd.s32 8, %v43_v1  ;;  %v45_v6 = vadd.s32 16, %v43_v1  ;;  %v177_v24 = vld [vmem:[#allocation2 + $0x18] sm:$0xff]  ;;  %630 = vmatprep.subr.mxu0 %v285_v23  ;;  %v175_v28 = vld [vmem:[#allocation2 + $0x8] sm:$0xff] }
  0x12   :  { %v46_v7 = vadd.s32 24, %v43_v1  ;;  %616 = vmatprep.subr.mxu1 %v177_v24  ;;  %v282_v29 = vld [vmem:[#allocation2 + $0x20] sm:$0xff]  ;;  %v440_v55 = vld [vmem:[%s847_s4 + $0x18] sm:$0xff]  ;;  %v439_v56 = vld [vmem:[%s847_s4 + $0x10] sm:$0xff] }
  0x13   :  { %vm50_vm2 = vcmp.ge.s32.totalorder %v43_v1, %v49_v3  ;;  %v55_v8 = vmul.u32 16, %v54_v4  ;;  %vm51_vm4 = vcmp.ge.s32.totalorder %v44_v5, %v49_v3  ;;  %vm52_vm5 = vcmp.ge.s32.totalorder %v45_v6, %v49_v3  ;;  %383 = vadd.xlane.f32.xlu0 %v382_v18  ;;  %617 = vmatpush3.msra.mxu1 %v177_v24  ;;  %v174_v30 = vld [vmem:[#allocation2] sm:$0xff]  ;;  %v438_v57 = vld [vmem:[%s847_s4 + $0x8] sm:$0xff] }
  0x14   :  { %vm53_vm10 = vcmp.ge.s32.totalorder %v46_v7, %v49_v3  ;;  %386 = vadd.xlane.f32.xlu1 %v385_v20  ;;  %618 = vmatprep.subr.mxu1 %v176_v26  ;;  %v437_v58 = vld [vmem:[%s847_s4] sm:$0xff] }
  0x15   :  { %vm56_vm6 = vcmp.lt.s32.totalorder %v43_v1, %v55_v8  ;;  %vm57_vm7 = vcmp.lt.s32.totalorder %v44_v5, %v55_v8  ;;  %vm58_vm9 = vcmp.lt.s32.totalorder %v45_v6, %v55_v8  ;;  %vm59_vm11 = vcmp.lt.s32.totalorder %v46_v7, %v55_v8  ;;  %619 = vmatpush3.msra.mxu1 %v176_v26  ;;  %v569_v7 = vld [vmem:[%s846_s3 + $0x1] ss:$0 sm:$0xff] }
  0x16   :  { %vm60_vm8 = vmand %vm50_vm2, %vm56_vm6  ;;  %620 = vmatprep.subr.mxu1 %v175_v28 }
  0x17   :  { %v555_v17 = vsel %vm60_vm8, 1.0, %v703_v16  ;;  %vm61_vm12 = vmand %vm51_vm4, %vm57_vm7  ;;  %621 = vmatpush3.msra.mxu1 %v175_v28 }
  0x18   :  { %610 = vmatprep.mubr.msk.f32.mxu0 %vm72_vm3, %v555_v17  ;;  %v556_v19 = vsel %vm61_vm12, 1.0, %v703_v16  ;;  %vm62_vm13 = vmand %vm52_vm5, %vm58_vm9  ;;  %622 = vmatprep.subr.mxu1 %v174_v30  ;;  %v564_v17 = vld [vmem:[%s846_s3] ss:$0 sm:$0xff] }
  0x19   :  { %611 = vmatmul.mubr.msk.f32.vlgmr.msra.gmra.mxu0 %vm72_vm3, %v556_v19  ;;  %v557_v21 = vsel %vm62_vm13, 1.0, %v703_v16  ;;  %vm63_vm14 = vmand %vm53_vm10, %vm59_vm11  ;;  %623 = vmatpush3.msra.mxu1 %v174_v30 }
  0x1a   :  { %613 = vmatprep.mubr.msk.f32.mxu0 %vm72_vm3, %v557_v21  ;;  %v558_v22 = vsel %vm63_vm14, 1.0, %v703_v16  ;;  %631 = vmatpush3.msra.mxu0 %v285_v23 }
  0x1b   :  { %632 = vmatprep.subr.mxu0 %v284_v25  ;;  %658 = vmatprep.subr.mxu1 %v440_v55 }
  0x1c   :  { %633 = vmatpush3.msra.mxu0 %v284_v25 }
  0x1d   :  { %614 = vmatmul.mubr.msk.f32.gmra.mxu0 %vm72_vm3, %v558_v22  ;;  %634 = vmatprep.subr.mxu0 %v283_v27 }
  0x1e   :  { %635 = vmatpush3.msra.mxu0 %v283_v27 }
  0x1f   :  { %636 = vmatprep.subr.mxu0 %v282_v29 }
  0x20   :  { %637 = vmatpush3.msra.mxu0 %v282_v29 }
  0x21   :  { %644 = vmatprep.subr.mxu0 %v440_v55 }
  0x98   :  { %v378_v31 = vpop.xlane.xlu0 %377 }
  0x99   :  { %v389_v32 = vmul.f32 0.03125, %v378_v31  ;;  %v381_v33 = vpop.xlane.xlu1 %380 }
  0x9a   :  { %v390_v34 = vmul.f32 0.03125, %v381_v33 }
  0x9b   :  { %v774_v35 = vsub.f32 %v745_v9, %v389_v32 }
  0x9c   :  { %v776_v36 = vsub.f32 %v38_v11, %v390_v34  ;;  %v384_v37 = vpop.xlane.xlu0 %383 }
  0x9d   :  { %v391_v38 = vmul.f32 0.03125, %v384_v37  ;;  %v387_v39 = vpop.xlane.xlu1 %386  ;;  %v397_v40 = vmul.f32 %v774_v35, %v774_v35 }
  0x9e   :  { %v392_v41 = vmul.f32 0.03125, %v387_v39  ;;  %v398_v42 = vmul.f32 %v776_v36, %v776_v36 }
  0x9f   :  { %v782_v43 = vsub.f32 %v39_v14, %v391_v38  ;;  %v401_v44 = vsel %vm183_vm0, %v397_v40, 0.0 }
  0xa0   :  { %v785_v45 = vsub.f32 %v40_v15, %v392_v41  ;;  %402 = vadd.xlane.f32.xlu0 %v401_v44  ;;  %v404_v46 = vsel %vm183_vm0, %v398_v42, 0.0  ;;  %v574_v41 = vld [vmem:[%s848_s5] ss:$0 sm:$0xff] }
  0xa1   :  { %v399_v47 = vmul.f32 %v782_v43, %v782_v43 }
  0xa2   :  { %v400_v48 = vmul.f32 %v785_v45, %v785_v45 }
  0xa3   :  { %v407_v49 = vsel %vm183_vm0, %v399_v47, 0.0 }
  0xa4   :  { %405 = vadd.xlane.f32.xlu0 %v404_v46  ;;  %408 = vadd.xlane.f32.xlu1 %v407_v49  ;;  %v410_v50 = vsel %vm183_vm0, %v400_v48, 0.0 }
  0xa8   :  { %411 = vadd.xlane.f32.xlu1 %v410_v50 }
  0xd9   :  { %v612_v51 = vpop.f32.mrf.mxu0 }
  0xdb   :  { %v155_v52 = vpop.f32.mrf.mxu0 }
  0xdc   :  { %624 = vmatprep.mubr.msk.f32.mxu1 %vm183_vm0, %v155_v52  ;;  %638 = vmatprep.mubr.msk.f32.mxu0 %vm183_vm0, %v155_v52 }
  0xdd   :  { %v615_v53 = vpop.f32.mrf.mxu0  ;;  %625 = vmatmul.mubr.msk.f32.vlgmr.msra.gmra.mxu1 %vm183_vm0, %v612_v51  ;;  %639 = vmatmul.mubr.msk.f32.vlgmr.msra.gmra.mxu0 %vm183_vm0, %v612_v51 }
  0xde   :  { %645 = vmatpush3.msra.mxu0 %v440_v55  ;;  %662 = vmatpush3.msra.mxu1 %v440_v55 }
  0xdf   :  { %v165_v54 = vpop.f32.mrf.mxu0  ;;  %646 = vmatprep.subr.mxu0 %v439_v56  ;;  %659 = vmatprep.subr.mxu1 %v439_v56 }
  0xe0   :  { %627 = vmatprep.mubr.msk.f32.mxu1 %vm183_vm0, %v165_v54  ;;  %641 = vmatprep.mubr.msk.f32.mxu0 %vm183_vm0, %v165_v54 }
  0xe1   :  { %628 = vmatmul.mubr.msk.f32.gmra.mxu1 %vm183_vm0, %v615_v53  ;;  %642 = vmatmul.mubr.msk.f32.gmra.mxu0 %vm183_vm0, %v615_v53 }
  0xe2   :  { %647 = vmatpush3.msra.mxu0 %v439_v56  ;;  %663 = vmatpush3.msra.mxu1 %v439_v56 }
  0xe3   :  { %648 = vmatprep.subr.mxu0 %v438_v57  ;;  %660 = vmatprep.subr.mxu1 %v438_v57 }
  0xe4   :  { %649 = vmatpush3.msra.mxu0 %v438_v57  ;;  %664 = vmatpush3.msra.mxu1 %v438_v57 }
  0xe5   :  { %650 = vmatprep.subr.mxu0 %v437_v58  ;;  %661 = vmatprep.subr.mxu1 %v437_v58 }
  0xe6   :  { %651 = vmatpush3.msra.mxu0 %v437_v58  ;;  %665 = vmatpush3.msra.mxu1 %v437_v58 }
 0x129   :  { %v403_v59 = vpop.xlane.xlu0 %402 }
 0x12a   :  { %v413_v63 = vmul.f32 0.03125, %v403_v59 }
 0x12c   :  { %v417_v3 = vadd.f32 1e-06, %v413_v63 }
 0x12d   :  { %v409_v60 = vpop.xlane.xlu1 %408  ;;  %v406_v61 = vpop.xlane.xlu0 %405 }
 0x12e   :  { %v414_v62 = vmul.f32 0.03125, %v406_v61  ;;  %v415_v4 = vmul.f32 0.03125, %v409_v60 }
 0x130   :  { %v418_v1 = vadd.f32 1e-06, %v414_v62  ;;  %v419_v6 = vadd.f32 1e-06, %v415_v4 }
 0x131   :  { %v412_v0 = vpop.xlane.xlu1 %411 }
 0x132   :  { %v416_v2 = vmul.f32 0.03125, %v412_v0  ;;  %670 = vrsqrt.f32 %v418_v1 }
 0x133   :  { %672 = vrsqrt.f32 %v417_v3 }
 0x134   :  { %v420_v5 = vadd.f32 1e-06, %v416_v2 }
 0x136   :  { %674 = vrsqrt.f32 %v420_v5 }
 0x137   :  { %676 = vrsqrt.f32 %v419_v6 }
 0x13f   :  { %v671_v8 = vpop.eup %670 }
 0x140   :  { %v673_v9 = vpop.eup %672  ;;  %v426_v13 = vmul.f32 %v671_v8, %v776_v36 }
 0x141   :  { %v425_v19 = vmul.f32 %v673_v9, %v774_v35 }
 0x143   :  { %v675_v16 = vpop.eup %674 }
 0x144   :  { %v677_v20 = vpop.eup %676  ;;  %v428_v28 = vmul.f32 %v675_v16, %v785_v45 }
 0x145   :  { %v427_v33 = vmul.f32 %v677_v20, %v782_v43 }
 0x19d   :  { %v626_v10 = vpop.f32.mrf.mxu1  ;;  %v640_v11 = vpop.f32.mrf.mxu0 }
 0x19e   :  { %v363_v12 = vadd.f32 %v640_v11, %v569_v7  ;;  %v268_v27 = vadd.f32 %v626_v10, %v564_v17 }
 0x19f   :  { %v262_v14 = vpop.f32.mrf.mxu1  ;;  %v357_v15 = vpop.f32.mrf.mxu0 }
 0x1a0   :  { %v358_v18 = vadd.f32 %v569_v7, %v357_v15  ;;  %v430_v21 = vmul.f32 %v426_v13, %v363_v12  ;;  %v263_v24 = vadd.f32 %v564_v17, %v262_v14 }
 0x1a1   :  { %v629_v22 = vpop.f32.mrf.mxu1  ;;  %v643_v23 = vpop.f32.mrf.mxu0 }
 0x1a2   :  { %v429_v25 = vmul.f32 %v425_v19, %v358_v18  ;;  %v373_v26 = vadd.f32 %v643_v23, %v569_v7  ;;  %v434_v34 = vadd.f32 %v430_v21, %v268_v27  ;;  %v278_v38 = vadd.f32 %v629_v22, %v564_v17 }
 0x1a3   :  { %v272_v29 = vpop.f32.mrf.mxu1  ;;  %v367_v30 = vpop.f32.mrf.mxu0 }
 0x1a4   :  { %v433_v31 = vadd.f32 %v429_v25, %v263_v24  ;;  %v368_v32 = vadd.f32 %v569_v7, %v367_v30  ;;  %v432_v36 = vmul.f32 %v428_v28, %v373_v26  ;;  %v273_v37 = vadd.f32 %v564_v17, %v272_v29 }
 0x1a6   :  { %v431_v35 = vmul.f32 %v427_v33, %v368_v32  ;;  %652 = vmatprep.mubr.msk.f32.mxu0 %vm183_vm0, %v433_v31  ;;  %v436_v40 = vadd.f32 %v432_v36, %v278_v38 }
 0x1a7   :  { %653 = vmatmul.mubr.msk.f32.vlgmr.msra.gmra.mxu0 %vm183_vm0, %v434_v34 }
 0x1a8   :  { %v435_v39 = vadd.f32 %v431_v35, %v273_v37 }
 0x1aa   :  { %655 = vmatprep.mubr.msk.f32.mxu1 %vm183_vm0, %v435_v39 }
 0x1ab   :  { %656 = vmatmul.mubr.msk.f32.vlgmr.msra.gmra.mxu1 %vm183_vm0, %v436_v40 }
 0x267   :  { %v654_v42 = vpop.f32.mrf.mxu0 }
 0x268   :  { %v532_v43 = vadd.f32 %v654_v42, %v574_v41 }
 0x269   :  { %v526_v44 = vpop.f32.mrf.mxu0 }
 0x26a   :  { %547 = vst.msk [vmem:[%s849_s6 + $0x8] sm:$0xff] %vm545_vm15, %v532_v43  ;;  %v527_v45 = vadd.f32 %v574_v41, %v526_v44 }
 0x26b   :  { %v657_v46 = vpop.f32.mrf.mxu1 }
 0x26c   :  { %546 = vst.msk [vmem:[%s849_s6] sm:$0xff] %vm545_vm15, %v527_v45  ;;  %v542_v47 = vadd.f32 %v657_v46, %v574_v41 }
 0x26d   :  { %v536_v48 = vpop.f32.mrf.mxu1 }
 0x26e   :  { %549 = vst.msk [vmem:[%s849_s6 + $0x18] sm:$0xff] %vm545_vm15, %v542_v47  ;;  %v537_v49 = vadd.f32 %v574_v41, %v536_v48 }
 0x270   :  { %548 = vst.msk [vmem:[%s849_s6 + $0x10] sm:$0xff] %vm545_vm15, %v537_v49 }
 0x271   :  { %554 = vsyncpa [#allocation3], 1 }

</bundles_post_ra>
